<compile_context>
chip_gen: v5e
topology: v5e:2x2
jax: 0.10.0
libtpu: 0.0.40
codegen_flags: <defaults>
</compile_context>

<pallas_src>
import jax
import jax.numpy as jnp
from jax.experimental import pallas as pl
from jax.experimental.pallas import tpu as pltpu

K = 7      # conv kernel size
PAD = 3    # conv padding


def spatial_attention_kernel(band_ref, bias_ref, x_ref, o_ref):
    # band_ref: VMEM f32[2*HW, HW]  flattened 7x7 "same"-conv matrix
    #           rows [0, HW)   -> avg-channel taps, rows [HW, 2*HW) -> max-channel taps
    # bias_ref: SMEM f32[1]          conv bias
    # x_ref   : VMEM (Bt, C, HW)     lane-dense input block (Bt batch elements)
    # o_ref   : VMEM (Bt, C, HW)
    Bt, C, HW = x_ref.shape

    x_blk = x_ref[...]                                      # native dtype, loaded once

    # Channel pooling: sum widened to f32 (the only full-tile cast), max in
    # native dtype with only the tiny (Bt, HW) result widened.
    sum_flat = jnp.sum(x_blk.astype(jnp.float32), axis=1)   # (Bt, HW) f32
    max_flat = jnp.max(x_blk, axis=1).astype(jnp.float32)   # (Bt, HW) f32

    # mean = sum * (1/C); kept in-kernel (exact in f32) so the conv weights in
    # band_ref stay bf16-exact for the MXU passes.
    inv_c = jnp.float32(1.0 / C)
    pooled = jnp.concatenate([sum_flat * inv_c, max_flat], axis=-1)   # (Bt, 2*HW)

    # Whole 7x7 conv (zero padding folded into band_ref) as ONE 2*HW-deep
    # MXU matmul -> (Bt, HW).
    z = jnp.dot(pooled, band_ref[...], preferred_element_type=jnp.float32)
    z = z + bias_ref[0]

    # Exact sigmoid (no approx reciprocal: attention errors multiply x).
    attn = 1.0 / (1.0 + jnp.exp(-z))                         # (Bt, HW) f32
    attn = attn.astype(x_blk.dtype)                          # tiny cast, not full tile

    # Final scale in x.dtype; sublane-broadcast of the (Bt, 1, HW) map over C.
    o_ref[...] = (x_blk * attn[:, None, :]).astype(o_ref.dtype)


def _flat_conv_matrix(conv_w, H, W):
    """Flattened 'same' 7x7 conv as a (2*HW, HW) matrix.

    M[c*HW + h_in*W + w_in, h_out*W + w_out] =
        conv_w[0, c, h_in - h_out + PAD, w_in - w_out + PAD]
    (zero where the tap falls outside the 7x7 kernel), c=0 -> avg, c=1 -> max.
    So  conv_out_flat = concat([avg_flat, max_flat], -1) @ M  (+ bias).
    Size is (2*HW)*HW*4 bytes; fine for CBAM-sized maps (HW <= ~2K).  For very
    large HW switch back to a banded, H-tiled (3-row halo) formulation.
    """
    HW = H * W
    w_ck = conv_w[0].astype(jnp.float32)                              # (2, K, K)
    dh = jnp.arange(H)[:, None] - jnp.arange(H)[None, :] + PAD        # (H_in, H_out)
    dw = jnp.arange(W)[:, None] - jnp.arange(W)[None, :] + PAD        # (W_in, W_out)
    vh = (dh >= 0) & (dh < K)
    vw = (dw >= 0) & (dw < K)
    valid = vh[:, None, :, None] & vw[None, :, None, :]               # (H,W,H,W)
    taps = w_ck[:, jnp.clip(dh, 0, K - 1)[:, None, :, None],
                   jnp.clip(dw, 0, K - 1)[None, :, None, :]]          # (2,H,W,H,W)
    m = jnp.where(valid[None], taps, 0.0)
    return m.reshape(2 * HW, HW)


def _vmem_capacity_bytes():
    """Physical VMEM per TensorCore, with a conservative fallback (v7x: 64 MiB)."""
    try:
        info = pltpu.get_tpu_info()
        cap = getattr(info, "vmem_capacity_bytes", None)
        if cap:
            return int(cap)
    except Exception:
        pass
    return 64 << 20


def spatial_attention(x, conv_w, conv_b):
    """x: (B, C, H, W); conv_w: (1, 2, 7, 7); conv_b: (1,)."""
    B, C, H, W = x.shape
    HW = H * W

    x_flat = x.reshape(B, C, HW)               # free reshape -> lane-dense stream
    band = _flat_conv_matrix(conv_w, H, W)     # (2*HW, HW) f32, VMEM-resident
    bias = conv_b.astype(jnp.float32)          # (1,) -> SMEM scalar

    itemsize = jnp.dtype(x.dtype).itemsize
    per_image_bytes = C * HW * itemsize

    # Pack batch elements per grid step until blocks reach ~2 MiB (HBM-stream
    # friendly), keeping Bt a divisor of B so blocks tile exactly.
    target_block = 2 << 20
    bt = max(1, min(B, target_block // max(per_image_bytes, 1)))
    while B % bt:
        bt -= 1

    block_bytes = bt * per_image_bytes
    band_bytes = 2 * HW * HW * 4

    # VMEM budget: double-buffered in/out blocks + resident band + headroom,
    # capped at ~80% of this generation's physical VMEM (v7x: 64 MiB/TC).
    cap = (_vmem_capacity_bytes() * 4) // 5
    needed = 4 * block_bytes + 2 * band_bytes + 4 * bt * HW * 4 + (2 << 20)
    vmem_limit = int(min(max(needed, 8 << 20), cap))

    cost = pl.CostEstimate(
        flops=B * (3 * C * HW + 4 * HW * HW + 6 * HW),
        transcendentals=B * HW,
        bytes_accessed=2 * B * per_image_bytes + band_bytes + 4,
    )

    # TODO(synk): for B==1 (or odd B) on v7x, add a second "parallel" grid axis
    # over H-tiles with a 3-row halo (banded conv form) to feed both TensorCores.
    out_flat = pl.pallas_call(
        spatial_attention_kernel,
        out_shape=jax.ShapeDtypeStruct((B, C, HW), x.dtype),
        grid=(B // bt,),
        in_specs=[
            pl.BlockSpec((2 * HW, HW), lambda b: (0, 0)),          # conv matrix (resident)
            pl.BlockSpec(memory_space=pltpu.MemorySpace.SMEM),     # bias scalar
            pl.BlockSpec((bt, C, HW), lambda b: (b, 0, 0)),        # x block
        ],
        out_specs=pl.BlockSpec((bt, C, HW), lambda b: (b, 0, 0)),
        compiler_params=pltpu.CompilerParams(
            dimension_semantics=("parallel",),
            vmem_limit_bytes=vmem_limit,
        ),
        cost_estimate=cost,
    )(band, bias, x_flat)

    return out_flat.reshape(B, C, H, W)


def spatial_attention_ref(x, conv_w, conv_b):
    """Pure-JAX reference matching the PyTorch module."""
    avg = jnp.mean(x, axis=1, keepdims=True)
    mx = jnp.max(x, axis=1, keepdims=True)
    scale = jnp.concatenate([avg, mx], axis=1)
    conv = jax.lax.conv_general_dilated(
        scale, conv_w, window_strides=(1, 1),
        padding=((PAD, PAD), (PAD, PAD)),
        dimension_numbers=("NCHW", "OIHW", "NCHW"),
        precision=jax.lax.Precision.HIGHEST,
    ) + conv_b[None, :, None, None]
    return jax.nn.sigmoid(conv) * x


if __name__ == "__main__":
    B, C, H, W = 2, 4, 16, 16

    key = jax.random.PRNGKey(0)
    kx, kw, kb = jax.random.split(key, 3)

    # Quantize test inputs to bf16-exact grids so the MXU conv (bf16-pass
    # decomposition of the f32 matmul) matches the HIGHEST-precision XLA
    # reference to ~f32 accuracy, allowing a tight tolerance.  For arbitrary
    # f32 inputs a realistic tolerance would be ~1e-2 relative to |x|.
    x = jnp.round(jax.random.normal(kx, (B, C, H, W), jnp.float32) * 4.0) / 4.0
    fan_in = 2 * K * K
    bound = 1.0 / (fan_in ** 0.5)
    conv_w = jnp.round(
        jax.random.uniform(kw, (1, 2, K, K), jnp.float32, -bound, bound) * 1024.0
    ) / 1024.0
    conv_b = jnp.round(
        jax.random.uniform(kb, (1,), jnp.float32, -bound, bound) * 1024.0
    ) / 1024.0

    out = jax.block_until_ready(spatial_attention(x, conv_w, conv_b))

    ref = spatial_attention_ref(x, conv_w, conv_b)
    assert out.shape == (B, C, H, W)
    max_err = float(jnp.max(jnp.abs(out - ref)))
    assert jnp.allclose(out, ref, atol=1e-4, rtol=1e-4), (
        f"mismatch vs reference (max abs err {max_err:.3e})")

    print("KERNEL_OK")
</pallas_src>

<mosaic_0001>
module attributes {stable_mosaic.version = 11 : i64} {
  func.func @spatial_attention_kernel(%arg0: i32, %arg1: memref<512x256xf32, #tpu.memory_space<vmem>>, %arg2: memref<1xf32, #tpu.memory_space<smem>>, %arg3: memref<2x4x256xf32, #tpu.memory_space<vmem>>, %arg4: memref<2x4x256xf32, #tpu.memory_space<vmem>>) attributes {dimension_semantics = [#tpu.dimension_semantics<parallel>], iteration_bounds = array<i64: 1>, scalar_prefetch = 0 : i64, scratch_operands = 0 : i64, tpu.core_type = #tpu.core_type<tc>, window_params = [{pipeline_mode = #tpu.pipeline_mode<synchronous>, transform_indices = @transform_0, window_bounds = array<i64: 512, 256>}, {transform_indices = @transform_1, window_bounds = array<i64: 1>}, {transform_indices = @transform_2, window_bounds = array<i64: 2, 4, 256>}, {transform_indices = @transform_3, window_bounds = array<i64: 2, 4, 256>}]} {
    %c0 = arith.constant 0 : index
    %c0_0 = arith.constant 0 : index
    %c0_1 = arith.constant 0 : index
    %0 = vector.load %arg3[%c0, %c0_0, %c0_1] : memref<2x4x256xf32, #tpu.memory_space<vmem>>, vector<2x4x256xf32>
    %cst = arith.constant dense<0.000000e+00> : vector<2x256xf32>
    %1 = vector.multi_reduction <add>, %0, %cst [1] : vector<2x4x256xf32> to vector<2x256xf32>
    %cst_2 = arith.constant dense<0xFF800000> : vector<2x256xf32>
    %2 = vector.multi_reduction <maximumf>, %0, %cst_2 [1] : vector<2x4x256xf32> to vector<2x256xf32>
    %cst_3 = arith.constant 2.500000e-01 : f32
    %3 = vector.broadcast %cst_3 : f32 to vector<2x256xf32>
    %4 = arith.mulf %1, %3 : vector<2x256xf32>
    %5 = tpu.concatenate %4, %2 in 1 : vector<2x256xf32>, vector<2x256xf32> -> vector<2x512xf32>
    %c0_4 = arith.constant 0 : index
    %c0_5 = arith.constant 0 : index
    %6 = vector.load %arg1[%c0_4, %c0_5] : memref<512x256xf32, #tpu.memory_space<vmem>>, vector<512x256xf32>
    %cst_6 = arith.constant dense<0.000000e+00> : vector<2x256xf32>
    %7 = tpu.matmul %5, %6, %cst_6 {dimension_numbers = #tpu.dot_dimension_numbers<[1], [0], [0], [1], [0, 0, 1, 1], [], []>} : vector<2x512xf32>, vector<512x256xf32>, vector<2x256xf32> -> vector<2x256xf32>
    %c0_7 = arith.constant 0 : index
    %8 = memref.load %arg2[%c0_7] : memref<1xf32, #tpu.memory_space<smem>>
    %9 = vector.broadcast %8 : f32 to vector<2x256xf32>
    %10 = arith.addf %7, %9 : vector<2x256xf32>
    %cst_8 = arith.constant 0.000000e+00 : f32
    %11 = vector.broadcast %cst_8 : f32 to vector<2x256xf32>
    %12 = arith.subf %11, %10 : vector<2x256xf32>
    %13 = math.exp %12 : vector<2x256xf32>
    %cst_9 = arith.constant 1.000000e+00 : f32
    %14 = vector.broadcast %cst_9 : f32 to vector<2x256xf32>
    %15 = arith.addf %14, %13 : vector<2x256xf32>
    %cst_10 = arith.constant 1.000000e+00 : f32
    %16 = vector.broadcast %cst_10 : f32 to vector<2x256xf32>
    %17 = arith.divf %16, %15 : vector<2x256xf32>
    %18 = vector.shape_cast %17 : vector<2x256xf32> to vector<2x1x256xf32>
    %19 = vector.broadcast %18 : vector<2x1x256xf32> to vector<2x4x256xf32>
    %20 = arith.mulf %0, %19 : vector<2x4x256xf32>
    %c0_11 = arith.constant 0 : index
    %c0_12 = arith.constant 0 : index
    %c0_13 = arith.constant 0 : index
    %21 = vector.load %arg4[%c0_11, %c0_12, %c0_13] : memref<2x4x256xf32, #tpu.memory_space<vmem>>, vector<2x4x256xf32>
    tpu.vector_store %arg4[%c0_11, %c0_12, %c0_13], %20 {strides = array<i32>} : memref<2x4x256xf32, #tpu.memory_space<vmem>>, vector<2x4x256xf32>,
    return
  }
  func.func @transform_0(%arg0: i32) -> (i32, i32) {
    %c0_i32 = arith.constant 0 : i32
    %c0_i32_0 = arith.constant 0 : i32
    %c0_i32_1 = arith.constant 0 : i32
    return %c0_i32, %c0_i32_0 : i32, i32
  }
  func.func @transform_1(%arg0: i32) -> i32 {
    %c0_i32 = arith.constant 0 : i32
    %c0_i32_0 = arith.constant 0 : i32
    return %c0_i32 : i32
  }
  func.func @transform_2(%arg0: i32) -> (i32, i32, i32) {
    %c0_i32 = arith.constant 0 : i32
    %c0_i32_0 = arith.constant 0 : i32
    %c0_i32_1 = arith.constant 0 : i32
    return %arg0, %c0_i32, %c0_i32_0 : i32, i32, i32
  }
  func.func @transform_3(%arg0: i32) -> (i32, i32, i32) {
    %c0_i32 = arith.constant 0 : i32
    %c0_i32_0 = arith.constant 0 : i32
    %c0_i32_1 = arith.constant 0 : i32
    return %arg0, %c0_i32, %c0_i32_0 : i32, i32, i32
  }
}

</mosaic_0001>

<bundles_post_ra>
// kernel: tpu_custom_call.1
= control target key start
LH: loop header
LB: loop body
LE: loop exit
PB: predicated region body
PF: predicated region fallthrough
CT: control target
= control target key end

     0   :  { %9 = vsyncpa [#allocation4], 0  ;;  %s688_s0 = inlined_call_operand.hbm [shape: f32[512,256], index: 0, kind: input, shape index: {}]   ;;  %s689_s1 = inlined_call_operand.<no memory space> [shape: f32[1], index: 1, kind: input, shape index: {}]   ;;  %s690_s2 = inlined_call_operand.hbm [shape: f32[2,4,256], index: 2, kind: input, shape index: {}]   ;;  %s691_s3 = inlined_call_operand.hbm [shape: f32[2,4,256], index: 3, kind: output, shape index: {}]  }
   0x1   :  { %10 = vsyncpa [#allocation7], 0 }
   0x2   :  { %11 = vsyncpa [#allocation5], 0  ;;  %s16_s14 = sshll.u32 %s688_s0, 4  ;;  %s614_s15 = smov [#allocation3]   ;;  %s17_s14 = int_to_ptr.hbm [resolvable:$true] %s16_s14 }
   0x3   :  { %s18_s16 = sshll.u32 %s614_s15, 4  ;;  %s31_s19 = sshll.u32 %s690_s2, 4  ;;  %s19_s16 = int_to_ptr.vmem [resolvable:$true] %s18_s16  ;;  %s32_s19 = int_to_ptr.hbm [resolvable:$true] %s31_s19 }
   0x4   :  { %s615_s20 = smov 256   ;;  %s616_s21 = smov 16  }
   0x5   :  { %24 = dma.hbm_to_vmem [thread:$0]  %s17_s14, 16384, %s19_s16, [#allocation4], %s615_s20, %s615_s20, %s616_s21  }
   0x6   :  { %s617_s22 = smov [#allocation6]   ;;  %s618_s24 = smov 128  }
   0x7   :  { %s33_s23 = sshll.u32 %s617_s22, 4  ;;  %s619_s25 = smov 8   ;;  %s34_s23 = int_to_ptr.vmem [resolvable:$true] %s33_s23 }
   0x8   :  { %39 = dma.hbm_to_vmem [thread:$0]  %s32_s19, 256, %s34_s23, [#allocation7], %s618_s24, %s618_s24, %s619_s25  }
   0x9   :  { %608 = dma.done.wait [#allocation4], 16384  }
   0xa   :  { %609 = vsyncadd [#allocation4], 4294950912 }
   0xb   :  { %610 = dma.done.wait [#allocation7], 256  }
   0xc   :  { %611 = vsyncadd [#allocation7], 4294967040  ;;  %v246_v0 = vld [vmem:[#allocation3 + $0x2f0] sm:$0xff]  ;;  %v244_v2 = vld [vmem:[#allocation3 + $0x2e0] sm:$0xff]  ;;  %vm63_vm0 = vcmask 1043456   ;;  %vm139_vm1 = vcmask 1041409  }
   0xd   :  { %v182_v1 = vld [vmem:[#allocation3 + $0xf0] sm:$0xff]  ;;  %322 = vmatpush.msra.mxu2 %v246_v0  ;;  %v180_v4 = vld [vmem:[#allocation3 + $0xe0] sm:$0xff]  ;;  %v652_v61 = vld [vmem:[#allocation6 + $0x8] sm:$0xff]  ;;  %vm483_vm10 = vcmask 1040384   ;;  %s507_s29 = sshll.u32 %s691_s3, 4  ;;  %s508_s29 = int_to_ptr.hbm [resolvable:$true] %s507_s29 }
   0xe   :  { %282 = vmatpush.msra.mxu0 %v182_v1  ;;  %v278_v3 = vld [vmem:[#allocation3 + $0x3f0] sm:$0xff]  ;;  %v276_v7 = vld [vmem:[#allocation3 + $0x3e0] sm:$0xff]  ;;  %56 = vst [vmem:[#allocation1 + $0x10] ss:$2 sm:$0xff] %v652_v61  ;;  %v247_v0 = vld [vmem:[#allocation3 + $0x2f8] sm:$0xff] }
   0xf   :  { %v214_v5 = vld [vmem:[#allocation3 + $0x1f0] sm:$0xff]  ;;  %342 = vmatpush.msra.mxu3 %v278_v3  ;;  %323 = vmatpush.msra.mxu2 %v244_v2  ;;  %v212_v9 = vld [vmem:[#allocation3 + $0x1e0] sm:$0xff]  ;;  %v183_v2 = vld [vmem:[#allocation3 + $0xf8] sm:$0xff] }
  0x10   :  { %302 = vmatpush.msra.mxu1 %v214_v5  ;;  %v242_v6 = vld [vmem:[#allocation3 + $0x2d0] sm:$0xff]  ;;  %283 = vmatpush.msra.mxu0 %v180_v4  ;;  %v240_v11 = vld [vmem:[#allocation3 + $0x2c0] sm:$0xff]  ;;  %v245_v3 = vld [vmem:[#allocation3 + $0x2e8] sm:$0xff] }
  0x11   :  { %v178_v8 = vld [vmem:[#allocation3 + $0xd0] sm:$0xff]  ;;  %343 = vmatpush.msra.mxu3 %v276_v7  ;;  %v176_v12 = vld [vmem:[#allocation3 + $0xc0] sm:$0xff]  ;;  %324 = vmatpush.msra.mxu2 %v242_v6  ;;  %v279_v4 = vld [vmem:[#allocation3 + $0x3f8] sm:$0xff] }
  0x12   :  { %v274_v10 = vld [vmem:[#allocation3 + $0x3d0] sm:$0xff]  ;;  %303 = vmatpush.msra.mxu1 %v212_v9  ;;  %284 = vmatpush.msra.mxu0 %v178_v8  ;;  %v272_v14 = vld [vmem:[#allocation3 + $0x3c0] sm:$0xff]  ;;  %v181_v6 = vld [vmem:[#allocation3 + $0xe8] sm:$0xff] }
  0x13   :  { %v210_v13 = vld [vmem:[#allocation3 + $0x1d0] sm:$0xff]  ;;  %v208_v15 = vld [vmem:[#allocation3 + $0x1c0] sm:$0xff]  ;;  %344 = vmatpush.msra.mxu3 %v274_v10  ;;  %325 = vmatpush.msra.mxu2 %v240_v11  ;;  %v215_v7 = vld [vmem:[#allocation3 + $0x1f8] sm:$0xff] }
  0x14   :  { %304 = vmatpush.msra.mxu1 %v210_v13  ;;  %v238_v16 = vld [vmem:[#allocation3 + $0x2b0] sm:$0xff]  ;;  %285 = vmatpush.msra.mxu0 %v176_v12  ;;  %v236_v20 = vld [vmem:[#allocation3 + $0x2a0] sm:$0xff]  ;;  %v243_v8 = vld [vmem:[#allocation3 + $0x2d8] sm:$0xff] }
  0x15   :  { %v174_v17 = vld [vmem:[#allocation3 + $0xb0] sm:$0xff]  ;;  %345 = vmatpush.msra.mxu3 %v272_v14  ;;  %v172_v21 = vld [vmem:[#allocation3 + $0xa0] sm:$0xff]  ;;  %326 = vmatpush.msra.mxu2 %v238_v16  ;;  %v277_v9 = vld [vmem:[#allocation3 + $0x3e8] sm:$0xff] }
  0x16   :  { %v270_v18 = vld [vmem:[#allocation3 + $0x3b0] sm:$0xff]  ;;  %305 = vmatpush.msra.mxu1 %v208_v15  ;;  %286 = vmatpush.msra.mxu0 %v174_v17  ;;  %v268_v22 = vld [vmem:[#allocation3 + $0x3a0] sm:$0xff]  ;;  %v179_v10 = vld [vmem:[#allocation3 + $0xd8] sm:$0xff] }
  0x17   :  { %v206_v19 = vld [vmem:[#allocation3 + $0x1b0] sm:$0xff]  ;;  %v204_v23 = vld [vmem:[#allocation3 + $0x1a0] sm:$0xff]  ;;  %346 = vmatpush.msra.mxu3 %v270_v18  ;;  %327 = vmatpush.msra.mxu2 %v236_v20  ;;  %v213_v11 = vld [vmem:[#allocation3 + $0x1e8] sm:$0xff] }
  0x18   :  { %306 = vmatpush.msra.mxu1 %v206_v19  ;;  %v234_v24 = vld [vmem:[#allocation3 + $0x290] sm:$0xff]  ;;  %287 = vmatpush.msra.mxu0 %v172_v21  ;;  %v232_v28 = vld [vmem:[#allocation3 + $0x280] sm:$0xff]  ;;  %v241_v12 = vld [vmem:[#allocation3 + $0x2c8] sm:$0xff] }
  0x19   :  { %v170_v25 = vld [vmem:[#allocation3 + $0x90] sm:$0xff]  ;;  %347 = vmatpush.msra.mxu3 %v268_v22  ;;  %v168_v29 = vld [vmem:[#allocation3 + $0x80] sm:$0xff]  ;;  %328 = vmatpush.msra.mxu2 %v234_v24  ;;  %v275_v13 = vld [vmem:[#allocation3 + $0x3d8] sm:$0xff] }
  0x1a   :  { %v266_v26 = vld [vmem:[#allocation3 + $0x390] sm:$0xff]  ;;  %307 = vmatpush.msra.mxu1 %v204_v23  ;;  %288 = vmatpush.msra.mxu0 %v170_v25  ;;  %v264_v30 = vld [vmem:[#allocation3 + $0x380] sm:$0xff]  ;;  %v177_v14 = vld [vmem:[#allocation3 + $0xc8] sm:$0xff] }
  0x1b   :  { %v202_v27 = vld [vmem:[#allocation3 + $0x190] sm:$0xff]  ;;  %v200_v31 = vld [vmem:[#allocation3 + $0x180] sm:$0xff]  ;;  %348 = vmatpush.msra.mxu3 %v266_v26  ;;  %329 = vmatpush.msra.mxu2 %v232_v28  ;;  %v211_v15 = vld [vmem:[#allocation3 + $0x1d8] sm:$0xff] }
  0x1c   :  { %308 = vmatpush.msra.mxu1 %v202_v27  ;;  %v230_v32 = vld [vmem:[#allocation3 + $0x270] sm:$0xff]  ;;  %289 = vmatpush.msra.mxu0 %v168_v29  ;;  %v228_v36 = vld [vmem:[#allocation3 + $0x260] sm:$0xff]  ;;  %v239_v18 = vld [vmem:[#allocation3 + $0x2b8] sm:$0xff] }
  0x1d   :  { %v166_v33 = vld [vmem:[#allocation3 + $0x70] sm:$0xff]  ;;  %349 = vmatpush.msra.mxu3 %v264_v30  ;;  %v164_v37 = vld [vmem:[#allocation3 + $0x60] sm:$0xff]  ;;  %330 = vmatpush.msra.mxu2 %v230_v32  ;;  %v273_v19 = vld [vmem:[#allocation3 + $0x3c8] sm:$0xff] }
  0x1e   :  { %v262_v34 = vld [vmem:[#allocation3 + $0x370] sm:$0xff]  ;;  %309 = vmatpush.msra.mxu1 %v200_v31  ;;  %290 = vmatpush.msra.mxu0 %v166_v33  ;;  %v260_v38 = vld [vmem:[#allocation3 + $0x360] sm:$0xff]  ;;  %v57_v20 = vld.sshfl [vmem:[#allocation1 + $0x10] sm:$0xff pattern:$0x75316420] }
  0x1f   :  { %v198_v35 = vld [vmem:[#allocation3 + $0x170] sm:$0xff]  ;;  %v196_v39 = vld [vmem:[#allocation3 + $0x160] sm:$0xff]  ;;  %350 = vmatpush.msra.mxu3 %v262_v34  ;;  %331 = vmatpush.msra.mxu2 %v228_v36  ;;  %v78_v23 = vsel %vm63_vm0, %v57_v20, 0.0  ;;  %v175_v30 = vld [vmem:[#allocation3 + $0xb8] sm:$0xff] }
  0x20   :  { %310 = vmatpush.msra.mxu1 %v198_v35  ;;  %v226_v40 = vld [vmem:[#allocation3 + $0x250] sm:$0xff]  ;;  %291 = vmatpush.msra.mxu0 %v164_v37  ;;  %v224_v44 = vld [vmem:[#allocation3 + $0x240] sm:$0xff]  ;;  %v79_v27 = vrot.slane %v78_v23, 4  ;;  %v209_v31 = vld [vmem:[#allocation3 + $0x1c8] sm:$0xff] }
  0x21   :  { %v162_v41 = vld [vmem:[#allocation3 + $0x50] sm:$0xff]  ;;  %351 = vmatpush.msra.mxu3 %v260_v38  ;;  %v160_v45 = vld [vmem:[#allocation3 + $0x40] sm:$0xff]  ;;  %332 = vmatpush.msra.mxu2 %v226_v40  ;;  %v237_v32 = vld [vmem:[#allocation3 + $0x2a8] sm:$0xff] }
  0x22   :  { %v258_v42 = vld [vmem:[#allocation3 + $0x350] sm:$0xff]  ;;  %311 = vmatpush.msra.mxu1 %v196_v39  ;;  %292 = vmatpush.msra.mxu0 %v162_v41  ;;  %v256_v46 = vld [vmem:[#allocation3 + $0x340] sm:$0xff]  ;;  %v271_v33 = vld [vmem:[#allocation3 + $0x3b8] sm:$0xff]  ;;  %v80_v35 = vadd.f32 %v79_v27, %v78_v23 }
  0x23   :  { %v194_v43 = vld [vmem:[#allocation3 + $0x150] sm:$0xff]  ;;  %v192_v47 = vld [vmem:[#allocation3 + $0x140] sm:$0xff]  ;;  %352 = vmatpush.msra.mxu3 %v258_v42  ;;  %333 = vmatpush.msra.mxu2 %v224_v44  ;;  %v173_v36 = vld [vmem:[#allocation3 + $0xa8] sm:$0xff] }
  0x24   :  { %312 = vmatpush.msra.mxu1 %v194_v43  ;;  %v222_v48 = vld [vmem:[#allocation3 + $0x230] sm:$0xff]  ;;  %293 = vmatpush.msra.mxu0 %v160_v45  ;;  %v220_v52 = vld [vmem:[#allocation3 + $0x220] sm:$0xff]  ;;  %v207_v38 = vld [vmem:[#allocation3 + $0x1b8] sm:$0xff]  ;;  %v81_v43 = vrot.slane %v80_v35, 2 }
  0x25   :  { %v158_v49 = vld [vmem:[#allocation3 + $0x30] sm:$0xff]  ;;  %353 = vmatpush.msra.mxu3 %v256_v46  ;;  %v156_v53 = vld [vmem:[#allocation3 + $0x20] sm:$0xff]  ;;  %334 = vmatpush.msra.mxu2 %v222_v48  ;;  %v235_v39 = vld [vmem:[#allocation3 + $0x298] sm:$0xff] }
  0x26   :  { %v254_v50 = vld [vmem:[#allocation3 + $0x330] sm:$0xff]  ;;  %313 = vmatpush.msra.mxu1 %v192_v47  ;;  %294 = vmatpush.msra.mxu0 %v158_v49  ;;  %v252_v54 = vld [vmem:[#allocation3 + $0x320] sm:$0xff]  ;;  %v269_v40 = vld [vmem:[#allocation3 + $0x3a8] sm:$0xff] }
  0x27   :  { %v190_v51 = vld [vmem:[#allocation3 + $0x130] sm:$0xff]  ;;  %v188_v55 = vld [vmem:[#allocation3 + $0x120] sm:$0xff]  ;;  %354 = vmatpush.msra.mxu3 %v254_v50  ;;  %335 = vmatpush.msra.mxu2 %v220_v52  ;;  %v171_v45 = vld [vmem:[#allocation3 + $0x98] sm:$0xff] }
  0x28   :  { %314 = vmatpush.msra.mxu1 %v190_v51  ;;  %v218_v56 = vld [vmem:[#allocation3 + $0x210] sm:$0xff]  ;;  %v650_v58 = vld [vmem:[#allocation6] sm:$0xff]  ;;  %295 = vmatpush.msra.mxu0 %v156_v53  ;;  %v205_v46 = vld [vmem:[#allocation3 + $0x1a8] sm:$0xff] }
  0x29   :  { %v154_v57 = vld [vmem:[#allocation3 + $0x10] sm:$0xff]  ;;  %52 = vst [vmem:[#allocation1] ss:$2 sm:$0xff] %v650_v58  ;;  %355 = vmatpush.msra.mxu3 %v252_v54  ;;  %v216_v62 = vld [vmem:[#allocation3 + $0x200] sm:$0xff]  ;;  %336 = vmatpush.msra.mxu2 %v218_v56  ;;  %v233_v47 = vld [vmem:[#allocation3 + $0x288] sm:$0xff]  ;;  %v82_v54 = vadd.f32 %v81_v43, %v80_v35 }
  0x2a   :  { %v250_v59 = vld [vmem:[#allocation3 + $0x310] sm:$0xff]  ;;  %315 = vmatpush.msra.mxu1 %v188_v55  ;;  %v152_v63 = vld [vmem:[#allocation3] sm:$0xff]  ;;  %296 = vmatpush.msra.mxu0 %v154_v57  ;;  %v267_v49 = vld [vmem:[#allocation3 + $0x398] sm:$0xff] }
  0x2b   :  { %v186_v60 = vld [vmem:[#allocation3 + $0x110] sm:$0xff]  ;;  %v248_v1 = vld [vmem:[#allocation3 + $0x300] sm:$0xff]  ;;  %356 = vmatpush.msra.mxu3 %v250_v59  ;;  %337 = vmatpush.msra.mxu2 %v216_v62  ;;  %v169_v50 = vld [vmem:[#allocation3 + $0x88] sm:$0xff] }
  0x2c   :  { %316 = vmatpush.msra.mxu1 %v186_v60  ;;  %297 = vmatpush.msra.mxu0 %v152_v63  ;;  %v184_v5 = vld [vmem:[#allocation3 + $0x100] sm:$0xff]  ;;  %v58_v21 = vld.sshfl [vmem:[#allocation1 + $0x18] sm:$0xff pattern:$0x75316420]  ;;  %v203_v51 = vld [vmem:[#allocation3 + $0x198] sm:$0xff] }
  0x2d   :  { %402 = vmatpush.msrb.mxu2 %v247_v0  ;;  %357 = vmatpush.msra.mxu3 %v248_v1  ;;  %v85_v25 = vsel %vm63_vm0, %v58_v21, 0.0  ;;  %96 = vst [vmem:[#allocation1 + $0x10] ss:$2 sm:$0xff] %v652_v61  ;;  %v231_v57 = vld [vmem:[#allocation3 + $0x278] sm:$0xff]  ;;  %v265_v0 = vld [vmem:[#allocation3 + $0x388] sm:$0xff] }
  0x2e   :  { %362 = vmatpush.msrb.mxu0 %v183_v2  ;;  %317 = vmatpush.msra.mxu1 %v184_v5  ;;  %v86_v29 = vrot.slane %v85_v25, 4  ;;  %v167_v5 = vld [vmem:[#allocation3 + $0x78] sm:$0xff]  ;;  %v165_v21 = vld [vmem:[#allocation3 + $0x68] sm:$0xff] }
  0x2f   :  { %422 = vmatpush.msrb.mxu3 %v279_v4  ;;  %403 = vmatpush.msrb.mxu2 %v245_v3  ;;  %v83_v4 = vrot.slane %v82_v54, 1  ;;  %v227_v27 = vld [vmem:[#allocation3 + $0x258] sm:$0xff]  ;;  %v161_v43 = vld [vmem:[#allocation3 + $0x48] sm:$0xff] }
  0x30   :  { %v53_v16 = vld.sshfl [vmem:[#allocation1] sm:$0xff pattern:$0x75316420]  ;;  %v54_v17 = vld.sshfl [vmem:[#allocation1 + $0x8] sm:$0xff pattern:$0x75316420]  ;;  %363 = vmatpush.msrb.mxu0 %v181_v6  ;;  %382 = vmatpush.msrb.mxu1 %v215_v7  ;;  %v87_v41 = vadd.f32 %v86_v29, %v85_v25 }
  0x31   :  { %404 = vmatpush.msrb.mxu2 %v243_v8  ;;  %423 = vmatpush.msrb.mxu3 %v277_v9  ;;  %92 = vst [vmem:[#allocation1] ss:$2 sm:$0xff] %v650_v58  ;;  %v64_v22 = vsel %vm63_vm0, %v53_v16, 0.0  ;;  %v71_v24 = vsel %vm63_vm0, %v54_v17, 0.0  ;;  %v201_v6 = vld [vmem:[#allocation3 + $0x188] sm:$0xff]  ;;  %v263_v16 = vld [vmem:[#allocation3 + $0x378] sm:$0xff] }
  0x32   :  { %364 = vmatpush.msrb.mxu0 %v179_v10  ;;  %383 = vmatpush.msrb.mxu1 %v213_v11  ;;  %v65_v26 = vrot.slane %v64_v22, 4  ;;  %v72_v28 = vrot.slane %v71_v24, 4  ;;  %v88_v48 = vrot.slane %v87_v41, 2 }
  0x33   :  { %405 = vmatpush.msrb.mxu2 %v241_v12  ;;  %424 = vmatpush.msrb.mxu3 %v275_v13  ;;  %v84_v13 = vadd.f32 %v83_v4, %v82_v54  ;;  %v159_v54 = vld [vmem:[#allocation3 + $0x38] sm:$0xff]  ;;  %v253_v4 = vld [vmem:[#allocation3 + $0x328] sm:$0xff] }
  0x34   :  { %365 = vmatpush.msrb.mxu0 %v177_v14  ;;  %384 = vmatpush.msrb.mxu1 %v211_v15  ;;  %v66_v34 = vadd.f32 %v65_v26, %v64_v22  ;;  %v73_v37 = vadd.f32 %v72_v28, %v71_v24  ;;  %v97_v59 = vld.sshfl [vmem:[#allocation1 + $0x10] sm:$0xff pattern:$0x75316420]  ;;  %v89_v63 = vadd.f32 %v88_v48, %v87_v41  ;;  %v98_v8 = vld.sshfl [vmem:[#allocation1 + $0x18] sm:$0xff pattern:$0x75316420] }
  0x35   :  { %406 = vmatpush.msrb.mxu2 %v239_v18  ;;  %425 = vmatpush.msrb.mxu3 %v273_v19  ;;  %v117_v2 = vsel %vm63_vm0, %v97_v59, -inf  ;;  %v124_v14 = vsel %vm63_vm0, %v98_v8, -inf  ;;  %v229_v15 = vld [vmem:[#allocation3 + $0x268] sm:$0xff]  ;;  %v199_v22 = vld [vmem:[#allocation3 + $0x178] sm:$0xff]  ;;  %v133_v25 = vmul.f32 0.25, %v84_v13 }
  0x36   :  { %366 = vmatpush.msrb.mxu0 %v175_v30  ;;  %385 = vmatpush.msrb.mxu1 %v209_v31  ;;  %v67_v42 = vrot.slane %v66_v34, 2  ;;  %v74_v44 = vrot.slane %v73_v37, 2  ;;  %v118_v7 = vrot.slane %v117_v2, 4  ;;  %v125_v19 = vrot.slane %v124_v14, 4  ;;  %v261_v31 = vld [vmem:[#allocation3 + $0x368] sm:$0xff] }
  0x37   :  { %407 = vmatpush.msrb.mxu2 %v237_v32  ;;  %426 = vmatpush.msrb.mxu3 %v271_v33  ;;  %v90_v26 = vrot.slane %v89_v63, 1  ;;  %v163_v32 = vld [vmem:[#allocation3 + $0x58] sm:$0xff]  ;;  %v217_v8 = vld [vmem:[#allocation3 + $0x208] sm:$0xff] }
  0x38   :  { %v93_v52 = vld.sshfl [vmem:[#allocation1] sm:$0xff pattern:$0x75316420]  ;;  %v68_v53 = vadd.f32 %v67_v42, %v66_v34  ;;  %v94_v55 = vld.sshfl [vmem:[#allocation1 + $0x8] sm:$0xff pattern:$0x75316420]  ;;  %367 = vmatpush.msrb.mxu0 %v173_v36  ;;  %386 = vmatpush.msrb.mxu1 %v207_v38  ;;  %v75_v56 = vadd.f32 %v74_v44, %v73_v37  ;;  %v119_v17 = vmax.f32 %v117_v2, %v118_v7 }
  0x39   :  { %v103_v60 = vsel %vm63_vm0, %v93_v52, -inf  ;;  %v110_v62 = vsel %vm63_vm0, %v94_v55, -inf  ;;  %408 = vmatpush.msrb.mxu2 %v235_v39  ;;  %427 = vmatpush.msrb.mxu3 %v269_v40  ;;  %v126_v30 = vmax.f32 %v124_v14, %v125_v19  ;;  %v91_v35 = vadd.f32 %v90_v26, %v89_v63  ;;  %v197_v37 = vld [vmem:[#allocation3 + $0x168] sm:$0xff]  ;;  %v259_v42 = vld [vmem:[#allocation3 + $0x358] sm:$0xff] }
  0x3a   :  { %v104_v1 = vrot.slane %v103_v60, 4  ;;  %v69_v3 = vrot.slane %v68_v53, 1  ;;  %368 = vmatpush.msrb.mxu0 %v171_v45  ;;  %387 = vmatpush.msrb.mxu1 %v205_v46  ;;  %v111_v9 = vrot.slane %v110_v62, 4  ;;  %v76_v10 = vrot.slane %v75_v56, 1  ;;  %v225_v38 = vld [vmem:[#allocation3 + $0x248] sm:$0xff]  ;;  %v223_v46 = vld [vmem:[#allocation3 + $0x238] sm:$0xff] }
  0x3b   :  { %409 = vmatpush.msrb.mxu2 %v233_v47  ;;  %428 = vmatpush.msrb.mxu3 %v267_v49  ;;  %v120_v28 = vrot.slane %v119_v17, 2  ;;  %v127_v41 = vrot.slane %v126_v30, 2  ;;  %v134_v45 = vmul.f32 0.25, %v91_v35  ;;  %v221_v55 = vld [vmem:[#allocation3 + $0x228] sm:$0xff]  ;;  %v191_v2 = vld [vmem:[#allocation3 + $0x138] sm:$0xff]  ;;  %v281_v14 = vstv %s689_s1  ;;  %s620_s1 = smov [#allocation8]  }
  0x3c   :  { %v105_v11 = vmax.f32 %v103_v60, %v104_v1  ;;  %v70_v12 = vadd.f32 %v69_v3, %v68_v53  ;;  %369 = vmatpush.msrb.mxu0 %v169_v50  ;;  %388 = vmatpush.msrb.mxu1 %v203_v51  ;;  %v112_v18 = vmax.f32 %v110_v62, %v111_v9  ;;  %v195_v50 = vld [vmem:[#allocation3 + $0x158] sm:$0xff]  ;;  %v257_v51 = vld [vmem:[#allocation3 + $0x348] sm:$0xff]  ;;  %s505_s26 = sshll.u32 %s620_s1, 4  ;;  %s506_s26 = int_to_ptr.vmem [resolvable:$true] %s505_s26 }
  0x3d   :  { %v77_v20 = vadd.f32 %v76_v10, %v75_v56  ;;  %410 = vmatpush.msrb.mxu2 %v231_v57  ;;  %429 = vmatpush.msrb.mxu3 %v265_v0  ;;  %v121_v39 = vmax.f32 %v119_v17, %v120_v28  ;;  %v128_v49 = vmax.f32 %v126_v30, %v127_v41  ;;  %v193_v60 = vld [vmem:[#allocation3 + $0x148] sm:$0xff]  ;;  %v255_v62 = vld [vmem:[#allocation3 + $0x338] sm:$0xff] }
  0x3e   :  { %v106_v23 = vrot.slane %v105_v11, 2  ;;  %v131_v24 = vmul.f32 0.25, %v70_v12  ;;  %370 = vmatpush.msrb.mxu0 %v167_v5  ;;  %389 = vmatpush.msrb.mxu1 %v201_v6  ;;  %v113_v29 = vrot.slane %v112_v18, 2  ;;  %v157_v63 = vld [vmem:[#allocation3 + $0x28] sm:$0xff]  ;;  %v219_v3 = vld [vmem:[#allocation3 + $0x218] sm:$0xff] }
  0x3f   :  { %411 = vmatpush.msrb.mxu2 %v229_v15  ;;  %430 = vmatpush.msrb.mxu3 %v263_v16  ;;  %v132_v36 = vmul.f32 0.25, %v77_v20  ;;  %v122_v47 = vrot.slane %v121_v39, 1  ;;  %v129_v59 = vrot.slane %v128_v49, 1  ;;  %v155_v6 = vld [vmem:[#allocation3 + $0x18] sm:$0xff]  ;;  %v189_v7 = vld [vmem:[#allocation3 + $0x128] sm:$0xff] }
  0x40   :  { %v107_v33 = vmax.f32 %v105_v11, %v106_v23  ;;  %v667_v34 = vsel %vm139_vm1, %v133_v25, %v131_v24  ;;  %371 = vmatpush.msrb.mxu0 %v165_v21  ;;  %390 = vmatpush.msrb.mxu1 %v199_v22  ;;  %v114_v40 = vmax.f32 %v112_v18, %v113_v29  ;;  %v251_v9 = vld [vmem:[#allocation3 + $0x318] sm:$0xff]  ;;  %v153_v10 = vld [vmem:[#allocation3 + $0x8] sm:$0xff] }
  0x41   :  { %298 = vmatmul.f32.vlgmr.msra.gmra.mxu0 %v667_v34  ;;  %412 = vmatpush.msrb.mxu2 %v227_v27  ;;  %v141_v53 = vsel %vm139_vm1, %v134_v45, %v132_v36  ;;  %v123_v56 = vmax.f32 %v121_v39, %v122_v47  ;;  %v130_v1 = vmax.f32 %v128_v49, %v129_v59  ;;  %v187_v11 = vld [vmem:[#allocation3 + $0x118] sm:$0xff]  ;;  %v249_v12 = vld [vmem:[#allocation3 + $0x308] sm:$0xff] }
  0x42   :  { %v108_v44 = vrot.slane %v107_v33, 1  ;;  %431 = vmatpush.msrb.mxu3 %v261_v31  ;;  %372 = vmatpush.msrb.mxu0 %v163_v32  ;;  %v115_v48 = vrot.slane %v114_v40, 1  ;;  %v185_v13 = vld [vmem:[#allocation3 + $0x108] sm:$0xff] }
  0x43   :  { %391 = vmatpush.msrb.mxu1 %v197_v37  ;;  %413 = vmatpush.msrb.mxu2 %v225_v38 }
  0x44   :  { %v109_v52 = vmax.f32 %v107_v33, %v108_v44  ;;  %432 = vmatpush.msrb.mxu3 %v259_v42  ;;  %373 = vmatpush.msrb.mxu0 %v161_v43  ;;  %v116_v57 = vmax.f32 %v114_v40, %v115_v48 }
  0x45   :  { %318 = vmatmul.f32.vlgmr.msra.gmra.mxu1 %v141_v53  ;;  %414 = vmatpush.msrb.mxu2 %v223_v46 }
  0x46   :  { %392 = vmatpush.msrb.mxu1 %v195_v50  ;;  %433 = vmatpush.msrb.mxu3 %v257_v51  ;;  %v148_v0 = vsel %vm139_vm1, %v123_v56, %v109_v52  ;;  %v149_v5 = vsel %vm139_vm1, %v130_v1, %v116_v57 }
  0x47   :  { %374 = vmatpush.msrb.mxu0 %v159_v54  ;;  %415 = vmatpush.msrb.mxu2 %v221_v55 }
  0x48   :  { %338 = vmatmul.f32.vlgmr.msra.gmra.mxu2 %v148_v0  ;;  %393 = vmatpush.msrb.mxu1 %v193_v60 }
  0x49   :  { %434 = vmatpush.msrb.mxu3 %v255_v62  ;;  %375 = vmatpush.msrb.mxu0 %v157_v63 }
  0x4a   :  { %358 = vmatmul.f32.vlgmr.msra.gmra.mxu3 %v149_v5  ;;  %394 = vmatpush.msrb.mxu1 %v191_v2 }
  0x4b   :  { %416 = vmatpush.msrb.mxu2 %v219_v3  ;;  %435 = vmatpush.msrb.mxu3 %v253_v4 }
  0x4c   :  { %376 = vmatpush.msrb.mxu0 %v155_v6  ;;  %395 = vmatpush.msrb.mxu1 %v189_v7 }
  0x4d   :  { %417 = vmatpush.msrb.mxu2 %v217_v8  ;;  %436 = vmatpush.msrb.mxu3 %v251_v9 }
  0x4e   :  { %377 = vmatpush.msrb.mxu0 %v153_v10  ;;  %396 = vmatpush.msrb.mxu1 %v187_v11 }
  0x4f   :  { %437 = vmatpush.msrb.mxu3 %v249_v12  ;;  %378 = vmatmul.f32.vlgmr.msrb.gmra.mxu0 %v667_v34 }
  0x50   :  { %418 = vmatmul.f32.vlgmr.msrb.gmra.mxu2 %v148_v0  ;;  %397 = vmatpush.msrb.mxu1 %v185_v13 }
  0x51   :  { %398 = vmatmul.f32.vlgmr.msrb.gmra.mxu1 %v141_v53 }
  0x52   :  { %438 = vmatmul.f32.vlgmr.msrb.gmra.mxu3 %v149_v5 }
  0xbe   :  { %v299_v15 = vpop.f32.mrf.mxu0 }
  0xbf   :  { %v300_v16 = vadd.f32 %v299_v15, %v281_v14 }
  0xc2   :  { %v319_v17 = vpop.f32.mrf.mxu1 }
  0xc3   :  { %v320_v18 = vadd.f32 %v319_v17, %v300_v16 }
  0xcb   :  { %v339_v19 = vpop.f32.mrf.mxu2 }
  0xcc   :  { %v340_v20 = vadd.f32 %v339_v19, %v320_v18  ;;  %v379_v21 = vpop.f32.mrf.mxu0 }
  0xcd   :  { %v359_v22 = vpop.f32.mrf.mxu3  ;;  %v380_v23 = vadd.f32 %v379_v21, %v281_v14 }
  0xce   :  { %v360_v24 = vadd.f32 %v359_v22, %v340_v20  ;;  %v399_v25 = vpop.f32.mrf.mxu1 }
  0xcf   :  { %v400_v27 = vadd.f32 %v399_v25, %v380_v23 }
  0xd0   :  { %v442_v26 = vsub.f32 0.0, %v360_v24 }
  0xd2   :  { %v444_v28 = vmul.f32 1.442695, %v442_v26 }
  0xd3   :  { %v419_v29 = vpop.f32.mrf.mxu2 }
  0xd4   :  { %528 = vpow2.f32 %v444_v28  ;;  %v420_v30 = vadd.f32 %v419_v29, %v400_v27 }
  0xd5   :  { %v439_v31 = vpop.f32.mrf.mxu3 }
  0xd6   :  { %v440_v32 = vadd.f32 %v439_v31, %v420_v30 }
  0xd8   :  { %v443_v33 = vsub.f32 0.0, %v440_v32 }
  0xda   :  { %v529_v34 = vpop.eup %528  ;;  %v446_v35 = vmul.f32 1.442695, %v443_v33 }
  0xdb   :  { %v448_v36 = vadd.f32 1.0, %v529_v34 }
  0xdc   :  { %530 = vpow2.f32 %v446_v35 }
  0xdd   :  { %532 = vrcp.f32 %v448_v36  ;;  %vm455_vm2 = vweird.f32 %v448_v36  ;;  %v459_v46 = vand.u32 2147483647, %v448_v36  ;;  %v461_v47 = vand.u32 2147483648, %v448_v36 }
  0xdf   :  { %v462_v53 = vor.u32 1.1754944e-38, %v461_v47  ;;  %vm460_vm8 = vcmp.eq.f32.partialorder %v459_v46, 8.507059e+37 }
  0xe2   :  { %v531_v37 = vpop.eup %530 }
  0xe3   :  { %v533_v38 = vpop.eup %532  ;;  %v449_v39 = vadd.f32 1.0, %v531_v37 }
  0xe4   :  { %v451_v40 = vmul.f32 %v533_v38, %v448_v36  ;;  %vm456_vm3 = vweird.f32 %v533_v38 }
  0xe5   :  { %534 = vrcp.f32 %v449_v39  ;;  %v476_v48 = vand.u32 2147483648, %v449_v39  ;;  %v474_v51 = vand.u32 2147483647, %v449_v39  ;;  %vm457_vm5 = vmor %vm455_vm2, %vm456_vm3  ;;  %vm470_vm6 = vweird.f32 %v449_v39 }
  0xe6   :  { %v452_v41 = vsub.f32 1.0, %v451_v40 }
  0xe7   :  { %v477_v54 = vor.u32 1.1754944e-38, %v476_v48  ;;  %vm475_vm9 = vcmp.eq.f32.partialorder %v474_v51, 8.507059e+37 }
  0xe8   :  { %v453_v43 = vmul.f32 %v533_v38, %v452_v41 }
  0xea   :  { %v454_v49 = vadd.f32 %v533_v38, %v453_v43 }
  0xeb   :  { %v535_v42 = vpop.eup %534 }
  0xec   :  { %v466_v44 = vmul.f32 %v535_v42, %v449_v39  ;;  %vm471_vm4 = vweird.f32 %v535_v42  ;;  %v458_v56 = vsel %vm457_vm5, %v533_v38, %v454_v49 }
  0xed   :  { %vm472_vm7 = vmor %vm470_vm6, %vm471_vm4  ;;  %v463_v60 = vsel %vm460_vm8, %v462_v53, %v458_v56 }
  0xee   :  { %v467_v45 = vsub.f32 1.0, %v466_v44 }
  0xf0   :  { %v468_v50 = vmul.f32 %v535_v42, %v467_v45 }
  0xf2   :  { %v469_v52 = vadd.f32 %v535_v42, %v468_v50 }
  0xf4   :  { %v473_v55 = vsel %vm472_vm7, %v535_v42, %v469_v52 }
  0xf5   :  { %v478_v57 = vsel %vm475_vm9, %v477_v54, %v473_v55 }
  0xf6   :  { %v482_v59 = vrot.slane %v478_v57, 7 }
  0xf8   :  { %v484_v62 = vsel %vm483_vm10, %v463_v60, %v482_v59  ;;  %v485_v63 = vsel %vm139_vm1, %v463_v60, %v482_v59 }
  0xf9   :  { %v486_v0 = vrot.slane %v485_v63, 1  ;;  %v488_v1 = vperm.slane %v484_v62, 1  ;;  %v487_v2 = vperm.slane %v484_v62, 0 }
  0xfb   :  { %v490_v3 = vperm.slane %v486_v0, 1  ;;  %v491_v4 = vrot.slane %v488_v1, 4  ;;  %v489_v5 = vperm.slane %v486_v0, 0 }
  0xfd   :  { %v492_v6 = vrot.slane %v490_v3, 4  ;;  %v493_v7 = vsel %vm63_vm0, %v487_v2, %v491_v4 }
  0xfe   :  { %v497_v8 = vmul.f32 %v493_v7, %v650_v58 }
  0xff   :  { %v494_v9 = vsel %vm63_vm0, %v489_v5, %v492_v6 }
 0x100   :  { %v498_v10 = vmul.f32 %v494_v9, %v652_v61  ;;  %499 = vst [vmem:[#allocation8] sm:$0xff] %v497_v8 }
 0x102   :  { %500 = vst [vmem:[#allocation8 + $0x8] sm:$0xff] %v498_v10 }
 0x103   :  { %513 = dma.vmem_to_hbm [thread:$0]  %s506_s26, 256, %s508_s29, [#allocation5], %s618_s24, %s618_s24, %s619_s25  }
 0x104   :  { %612 = dma.done.wait [#allocation5], 256  }
 0x105   :  { %613 = vsyncadd [#allocation5], 4294967040 }
 0x106   :  { %518 = vsyncpa [#allocation4], 1 }
 0x107   :  { %519 = vsyncpa [#allocation7], 1 }
 0x108   :  { %520 = vsyncpa [#allocation5], 1 }

</bundles_post_ra>
